<compile_context>
chip_gen: v7x
topology: tpu7x:2x2x1
jax: 0.10.0
libtpu: 0.0.40
codegen_flags: <defaults>
</compile_context>

<pallas_src>
import math
from functools import partial

import jax
import jax.numpy as jnp
from jax.experimental import pallas as pl
from jax.experimental.pallas import tpu as pltpu

# small, self-consistent hyper-parameters (scaled-down ParaModel)
HEADS = 4           # model_parameters.attention_heads
HEAD_DIM = 8        # model_parameters.attention_dim
HIDDEN = 32         # model_parameters.hidden_size
MASK_FILL = -1.0e9  # masked_fill_ value in the PyTorch code


def atten_kernel(q_ref, k_ref, v_ref, mask_ref, wo_ref, bo_ref,
                 scores_ref, out_ref, *, batch_size, num_heads):
    """Fused scaled-dot-product attention + output projection.

    q/k/v:   (G, S, D) bf16, G = batch*heads (batch-major: g = b*heads + h)
    mask:    (G, S, S) f32, nonzero == masked position
    wo:      (heads, D, HIDDEN) bf16  -- un-replicated W_o^T, split per head
    bo:      (1, HIDDEN) f32          -- output-projection bias
    scores:  (G, S, S) f32            -- softmax attention probabilities
    out:     (B, S, HIDDEN) f32       -- projected attention result
    """
    q = q_ref[...]
    k = k_ref[...]
    v = v_ref[...]
    mask = mask_ref[...]

    seq = q.shape[1]
    d = q.shape[-1]
    scale = 1.0 / math.sqrt(d)

    # ---- scores = Q @ K^T / sqrt(d): one batched bf16 MXU matmul, f32 accum ----
    s = jnp.einsum('gqd,gkd->gqk', q, k,
                   preferred_element_type=jnp.float32) * scale
    # masked_fill_ semantics (compare+select kept so fully-masked rows match torch)
    s = jnp.where(mask != 0.0, MASK_FILL, s)

    # ---- numerically-stable softmax over keys (f32, exact normalization) ----
    s = s - jnp.max(s, axis=-1, keepdims=True)
    e = jnp.exp(s)
    p = e / jnp.sum(e, axis=-1, keepdims=True)
    scores_ref[...] = p                                 # user-visible probabilities

    # ---- context = scores @ V: one batched bf16 MXU matmul, f32 accum ----
    ctx = jnp.einsum('gqk,gkd->gqd', p.astype(jnp.bfloat16), v,
                     preferred_element_type=jnp.float32)   # (G, S, D) f32

    # ---- output projection ("concat heads" then Linear(Wo)) ----
    # out[b, q, :] = sum_h ctx[b*heads + h, q, :] @ WoT[h*D:(h+1)*D, :] + bias
    # `heads` tile-aligned 2D matmuls accumulated in f32 (same MACs as one
    # (B*S, heads*D) matmul, no lane-direction relayout of ctx needed).
    wo = wo_ref[...]                                    # (heads, D, HIDDEN) bf16
    proj = None
    for h in range(num_heads):                          # static unroll (heads == 4)
        xh = jnp.concatenate(
            [ctx[b * num_heads + h] for b in range(batch_size)], axis=0)  # (B*S, D) f32
        d_h = jnp.dot(xh.astype(jnp.bfloat16), wo[h],
                      preferred_element_type=jnp.float32)                 # (B*S, HIDDEN)
        proj = d_h if proj is None else proj + d_h
    out = proj + bo_ref[...]                            # (B*S, HIDDEN) + (1, HIDDEN)
    out_ref[...] = out.reshape(batch_size, seq, out.shape[-1])


def get_scaled_atten_score(Q, K, V, wo_weight, wo_bias, atten_masks):
    """Pallas implementation of GetScaledAttenScore.forward.

    Q, K, V     : (B, heads, S, D) float32
    wo_weight   : (HIDDEN, heads*D)  -- torch nn.Linear weight layout (y = x @ W.T + b)
    wo_bias     : (HIDDEN,)
    atten_masks : broadcastable to (B, heads, S, S); True / nonzero == masked
    returns (atten_scores (B, heads, S, S), atten_result (B, S, HIDDEN))
    """
    B, Hn, S, D = Q.shape
    G = B * Hn
    hidden = wo_weight.shape[0]

    # bf16 MXU operands (halves Q/K/V/Wo DMA bytes; f32 accumulation in-kernel)
    qf = Q.astype(jnp.bfloat16).reshape(G, S, D)
    kf = K.astype(jnp.bfloat16).reshape(G, S, D)
    vf = V.astype(jnp.bfloat16).reshape(G, S, D)
    maskf = jnp.broadcast_to(atten_masks, (B, Hn, S, S)).astype(jnp.float32)
    maskf = maskf.reshape(G, S, S)

    # y = x @ W.T + b  ->  pass W.T split per head, UN-replicated: (heads, D, HIDDEN)
    wo_h = wo_weight.astype(jnp.bfloat16).T.reshape(Hn, D, hidden)
    bo = wo_bias.astype(jnp.float32).reshape(1, hidden)

    # advisory cost: 2 attention matmuls + output projection; exp per score element
    flops = 2 * G * S * S * D * 2 + 2 * (B * S) * (Hn * D) * hidden
    bytes_accessed = ((qf.size + kf.size + vf.size + wo_h.size) * 2
                      + (maskf.size + bo.size) * 4
                      + (G * S * S + B * S * hidden) * 4)
    cost = pl.CostEstimate(flops=flops, transcendentals=G * S * S,
                           bytes_accessed=bytes_accessed)

    vmem = lambda: pl.BlockSpec(memory_space=pltpu.MemorySpace.VMEM)
    scores_flat, result = pl.pallas_call(
        partial(atten_kernel, batch_size=B, num_heads=Hn),
        out_shape=(
            jax.ShapeDtypeStruct((G, S, S), jnp.float32),
            jax.ShapeDtypeStruct((B, S, hidden), jnp.float32),
        ),
        in_specs=[vmem() for _ in range(6)],
        out_specs=(vmem(), vmem()),
        cost_estimate=cost,
    )(qf, kf, vf, maskf, wo_h, bo)

    # leading-dim split only (free); no transpose needed
    return scores_flat.reshape(B, Hn, S, S), result


# ---------------- pure-JAX reference (for a sanity check) -------------------
def reference(Q, K, V, wo_weight, wo_bias, atten_masks):
    d = Q.shape[-1]
    s = jnp.einsum('bhqd,bhkd->bhqk', Q, K) / math.sqrt(d)
    s = jnp.where(atten_masks, MASK_FILL, s)
    p = jax.nn.softmax(s, axis=-1)
    ctx = jnp.einsum('bhqk,bhkd->bhqd', p, V)
    B, Hn, S, D = Q.shape
    ctx = jnp.transpose(ctx, (0, 2, 1, 3)).reshape(B, S, Hn * D)
    out = ctx @ wo_weight.T + wo_bias
    return p, out


if __name__ == "__main__":
    key = jax.random.PRNGKey(0)
    kq, kk, kv, kw, kb = jax.random.split(key, 5)

    B, S = 2, 8
    Q = jax.random.normal(kq, (B, HEADS, S, HEAD_DIM), jnp.float32)
    K = jax.random.normal(kk, (B, HEADS, S, HEAD_DIM), jnp.float32)
    V = jax.random.normal(kv, (B, HEADS, S, HEAD_DIM), jnp.float32)
    wo_weight = 0.02 * jax.random.normal(kw, (HIDDEN, HEADS * HEAD_DIM), jnp.float32)
    wo_bias = 0.02 * jax.random.normal(kb, (HIDDEN,), jnp.float32)

    # attention mask: causal (strictly upper triangular) + pad mask
    # (last two key positions of batch 0 are padding), True == masked
    causal = jnp.triu(jnp.ones((S, S), dtype=bool), k=1)
    pad = jnp.zeros((B, S), dtype=bool).at[0, -2:].set(True)
    atten_masks = causal[None, None, :, :] | pad[:, None, None, :]
    atten_masks = jnp.broadcast_to(atten_masks, (B, HEADS, S, S))

    scores, result = get_scaled_atten_score(Q, K, V, wo_weight, wo_bias, atten_masks)
    scores = jax.block_until_ready(scores)
    result = jax.block_until_ready(result)

    assert scores.shape == (B, HEADS, S, S)
    assert result.shape == (B, S, HIDDEN)

    # correctness vs. pure-JAX f32 reference (loose tol: kernel uses bf16 MXU
    # operands with f32 accumulation, reference uses f32 at XLA default precision)
    ref_scores, ref_result = reference(Q, K, V, wo_weight, wo_bias, atten_masks)
    assert jnp.allclose(scores, ref_scores, atol=3e-2, rtol=3e-2)
    assert jnp.allclose(result, ref_result, atol=3e-2, rtol=3e-2)

    print("KERNEL_OK")
</pallas_src>

<mosaic_0001>
module attributes {stable_mosaic.version = 11 : i64} {
  func.func @atten_kernel(%arg0: memref<8x8x8xbf16, #tpu.memory_space<vmem>>, %arg1: memref<8x8x8xbf16, #tpu.memory_space<vmem>>, %arg2: memref<8x8x8xbf16, #tpu.memory_space<vmem>>, %arg3: memref<8x8x8xf32, #tpu.memory_space<vmem>>, %arg4: memref<4x8x32xbf16, #tpu.memory_space<vmem>>, %arg5: memref<1x32xf32, #tpu.memory_space<vmem>>, %arg6: memref<8x8x8xf32, #tpu.memory_space<vmem>>, %arg7: memref<2x8x32xf32, #tpu.memory_space<vmem>>) attributes {dimension_semantics = [], scalar_prefetch = 0 : i64, scratch_operands = 0 : i64, tpu.core_type = #tpu.core_type<tc>} {
    %c0 = arith.constant 0 : index
    %c0_0 = arith.constant 0 : index
    %c0_1 = arith.constant 0 : index
    %0 = vector.load %arg0[%c0, %c0_0, %c0_1] : memref<8x8x8xbf16, #tpu.memory_space<vmem>>, vector<8x8x8xbf16>
    %c0_2 = arith.constant 0 : index
    %c0_3 = arith.constant 0 : index
    %c0_4 = arith.constant 0 : index
    %1 = vector.load %arg1[%c0_2, %c0_3, %c0_4] : memref<8x8x8xbf16, #tpu.memory_space<vmem>>, vector<8x8x8xbf16>
    %c0_5 = arith.constant 0 : index
    %c0_6 = arith.constant 0 : index
    %c0_7 = arith.constant 0 : index
    %2 = vector.load %arg2[%c0_5, %c0_6, %c0_7] : memref<8x8x8xbf16, #tpu.memory_space<vmem>>, vector<8x8x8xbf16>
    %c0_8 = arith.constant 0 : index
    %c0_9 = arith.constant 0 : index
    %c0_10 = arith.constant 0 : index
    %3 = vector.load %arg3[%c0_8, %c0_9, %c0_10] : memref<8x8x8xf32, #tpu.memory_space<vmem>>, vector<8x8x8xf32>
    "tpu.trace_start"() <{level = 10 : i32, message = "gqd,gkd->gqk"}> : () -> ()
    %cst = arith.constant dense<0.000000e+00> : vector<8x8x8xf32>
    %4 = tpu.matmul %0, %1, %cst {dimension_numbers = #tpu.dot_dimension_numbers<[2], [2], [1], [1], [0, 0, 0, 1, 1, 1], [0], [0]>} : vector<8x8x8xbf16>, vector<8x8x8xbf16>, vector<8x8x8xf32> -> vector<8x8x8xf32>
    "tpu.trace_stop"() : () -> ()
    %cst_11 = arith.constant 0.353553385 : f32
    %5 = vector.broadcast %cst_11 : f32 to vector<8x8x8xf32>
    %6 = arith.mulf %4, %5 : vector<8x8x8xf32>
    %cst_12 = arith.constant 0.000000e+00 : f32
    %7 = vector.broadcast %cst_12 : f32 to vector<8x8x8xf32>
    %8 = arith.cmpf one, %3, %7 : vector<8x8x8xf32>
    %cst_13 = arith.constant -1.000000e+09 : f32
    %9 = vector.broadcast %cst_13 : f32 to vector<8x8x8xf32>
    %10 = arith.select %8, %9, %6 : vector<8x8x8xi1>, vector<8x8x8xf32>
    %cst_14 = arith.constant dense<0xFF800000> : vector<8x8xf32>
    %11 = vector.multi_reduction <maximumf>, %10, %cst_14 [2] : vector<8x8x8xf32> to vector<8x8xf32>
    %12 = vector.shape_cast %11 : vector<8x8xf32> to vector<8x8x1xf32>
    %13 = vector.broadcast %12 : vector<8x8x1xf32> to vector<8x8x8xf32>
    %14 = arith.subf %10, %13 : vector<8x8x8xf32>
    %15 = math.exp %14 : vector<8x8x8xf32>
    %cst_15 = arith.constant dense<0.000000e+00> : vector<8x8xf32>
    %16 = vector.multi_reduction <add>, %15, %cst_15 [2] : vector<8x8x8xf32> to vector<8x8xf32>
    %17 = vector.shape_cast %16 : vector<8x8xf32> to vector<8x8x1xf32>
    %18 = vector.broadcast %17 : vector<8x8x1xf32> to vector<8x8x8xf32>
    %19 = arith.divf %15, %18 : vector<8x8x8xf32>
    %c0_16 = arith.constant 0 : index
    %c0_17 = arith.constant 0 : index
    %c0_18 = arith.constant 0 : index
    %20 = vector.load %arg6[%c0_16, %c0_17, %c0_18] : memref<8x8x8xf32, #tpu.memory_space<vmem>>, vector<8x8x8xf32>
    tpu.vector_store %arg6[%c0_16, %c0_17, %c0_18], %19 {strides = array<i32>} : memref<8x8x8xf32, #tpu.memory_space<vmem>>, vector<8x8x8xf32>,
    %21 = arith.truncf %19 : vector<8x8x8xf32> to vector<8x8x8xbf16>
    "tpu.trace_start"() <{level = 10 : i32, message = "gqk,gkd->gqd"}> : () -> ()
    %cst_19 = arith.constant dense<0.000000e+00> : vector<8x8x8xf32>
    %22 = tpu.matmul %21, %2, %cst_19 {dimension_numbers = #tpu.dot_dimension_numbers<[2], [1], [1], [2], [0, 0, 0, 1, 1, 2], [0], [0]>} : vector<8x8x8xbf16>, vector<8x8x8xbf16>, vector<8x8x8xf32> -> vector<8x8x8xf32>
    "tpu.trace_stop"() : () -> ()
    %c0_20 = arith.constant 0 : index
    %c0_21 = arith.constant 0 : index
    %c0_22 = arith.constant 0 : index
    %23 = vector.load %arg4[%c0_20, %c0_21, %c0_22] : memref<4x8x32xbf16, #tpu.memory_space<vmem>>, vector<4x8x32xbf16>
    %24 = vector.extract_strided_slice %22 {offsets = [0, 0, 0], sizes = [1, 8, 8], strides = [1, 1, 1]} : vector<8x8x8xf32> to vector<1x8x8xf32>
    %25 = vector.shape_cast %24 : vector<1x8x8xf32> to vector<8x8xf32>
    %26 = vector.extract_strided_slice %22 {offsets = [4, 0, 0], sizes = [1, 8, 8], strides = [1, 1, 1]} : vector<8x8x8xf32> to vector<1x8x8xf32>
    %27 = vector.shape_cast %26 : vector<1x8x8xf32> to vector<8x8xf32>
    %28 = tpu.concatenate %25, %27 in 0 : vector<8x8xf32>, vector<8x8xf32> -> vector<16x8xf32>
    %29 = arith.truncf %28 : vector<16x8xf32> to vector<16x8xbf16>
    %30 = vector.extract_strided_slice %23 {offsets = [0, 0, 0], sizes = [1, 8, 32], strides = [1, 1, 1]} : vector<4x8x32xbf16> to vector<1x8x32xbf16>
    %31 = vector.shape_cast %30 : vector<1x8x32xbf16> to vector<8x32xbf16>
    %cst_23 = arith.constant dense<0.000000e+00> : vector<16x32xf32>
    %32 = tpu.matmul %29, %31, %cst_23 {dimension_numbers = #tpu.dot_dimension_numbers<[1], [0], [0], [1], [0, 0, 1, 1], [], []>} : vector<16x8xbf16>, vector<8x32xbf16>, vector<16x32xf32> -> vector<16x32xf32>
    %33 = vector.extract_strided_slice %22 {offsets = [1, 0, 0], sizes = [1, 8, 8], strides = [1, 1, 1]} : vector<8x8x8xf32> to vector<1x8x8xf32>
    %34 = vector.shape_cast %33 : vector<1x8x8xf32> to vector<8x8xf32>
    %35 = vector.extract_strided_slice %22 {offsets = [5, 0, 0], sizes = [1, 8, 8], strides = [1, 1, 1]} : vector<8x8x8xf32> to vector<1x8x8xf32>
    %36 = vector.shape_cast %35 : vector<1x8x8xf32> to vector<8x8xf32>
    %37 = tpu.concatenate %34, %36 in 0 : vector<8x8xf32>, vector<8x8xf32> -> vector<16x8xf32>
    %38 = arith.truncf %37 : vector<16x8xf32> to vector<16x8xbf16>
    %39 = vector.extract_strided_slice %23 {offsets = [1, 0, 0], sizes = [1, 8, 32], strides = [1, 1, 1]} : vector<4x8x32xbf16> to vector<1x8x32xbf16>
    %40 = vector.shape_cast %39 : vector<1x8x32xbf16> to vector<8x32xbf16>
    %cst_24 = arith.constant dense<0.000000e+00> : vector<16x32xf32>
    %41 = tpu.matmul %38, %40, %cst_24 {dimension_numbers = #tpu.dot_dimension_numbers<[1], [0], [0], [1], [0, 0, 1, 1], [], []>} : vector<16x8xbf16>, vector<8x32xbf16>, vector<16x32xf32> -> vector<16x32xf32>
    %42 = arith.addf %32, %41 : vector<16x32xf32>
    %43 = vector.extract_strided_slice %22 {offsets = [2, 0, 0], sizes = [1, 8, 8], strides = [1, 1, 1]} : vector<8x8x8xf32> to vector<1x8x8xf32>
    %44 = vector.shape_cast %43 : vector<1x8x8xf32> to vector<8x8xf32>
    %45 = vector.extract_strided_slice %22 {offsets = [6, 0, 0], sizes = [1, 8, 8], strides = [1, 1, 1]} : vector<8x8x8xf32> to vector<1x8x8xf32>
    %46 = vector.shape_cast %45 : vector<1x8x8xf32> to vector<8x8xf32>
    %47 = tpu.concatenate %44, %46 in 0 : vector<8x8xf32>, vector<8x8xf32> -> vector<16x8xf32>
    %48 = arith.truncf %47 : vector<16x8xf32> to vector<16x8xbf16>
    %49 = vector.extract_strided_slice %23 {offsets = [2, 0, 0], sizes = [1, 8, 32], strides = [1, 1, 1]} : vector<4x8x32xbf16> to vector<1x8x32xbf16>
    %50 = vector.shape_cast %49 : vector<1x8x32xbf16> to vector<8x32xbf16>
    %cst_25 = arith.constant dense<0.000000e+00> : vector<16x32xf32>
    %51 = tpu.matmul %48, %50, %cst_25 {dimension_numbers = #tpu.dot_dimension_numbers<[1], [0], [0], [1], [0, 0, 1, 1], [], []>} : vector<16x8xbf16>, vector<8x32xbf16>, vector<16x32xf32> -> vector<16x32xf32>
    %52 = arith.addf %42, %51 : vector<16x32xf32>
    %53 = vector.extract_strided_slice %22 {offsets = [3, 0, 0], sizes = [1, 8, 8], strides = [1, 1, 1]} : vector<8x8x8xf32> to vector<1x8x8xf32>
    %54 = vector.shape_cast %53 : vector<1x8x8xf32> to vector<8x8xf32>
    %55 = vector.extract_strided_slice %22 {offsets = [7, 0, 0], sizes = [1, 8, 8], strides = [1, 1, 1]} : vector<8x8x8xf32> to vector<1x8x8xf32>
    %56 = vector.shape_cast %55 : vector<1x8x8xf32> to vector<8x8xf32>
    %57 = tpu.concatenate %54, %56 in 0 : vector<8x8xf32>, vector<8x8xf32> -> vector<16x8xf32>
    %58 = arith.truncf %57 : vector<16x8xf32> to vector<16x8xbf16>
    %59 = vector.extract_strided_slice %23 {offsets = [3, 0, 0], sizes = [1, 8, 32], strides = [1, 1, 1]} : vector<4x8x32xbf16> to vector<1x8x32xbf16>
    %60 = vector.shape_cast %59 : vector<1x8x32xbf16> to vector<8x32xbf16>
    %cst_26 = arith.constant dense<0.000000e+00> : vector<16x32xf32>
    %61 = tpu.matmul %58, %60, %cst_26 {dimension_numbers = #tpu.dot_dimension_numbers<[1], [0], [0], [1], [0, 0, 1, 1], [], []>} : vector<16x8xbf16>, vector<8x32xbf16>, vector<16x32xf32> -> vector<16x32xf32>
    %62 = arith.addf %52, %61 : vector<16x32xf32>
    %c0_27 = arith.constant 0 : index
    %c0_28 = arith.constant 0 : index
    %63 = vector.load %arg5[%c0_27, %c0_28] : memref<1x32xf32, #tpu.memory_space<vmem>>, vector<1x32xf32>
    %64 = vector.broadcast %63 : vector<1x32xf32> to vector<16x32xf32>
    %65 = arith.addf %62, %64 : vector<16x32xf32>
    %66 = vector.shape_cast %65 : vector<16x32xf32> to vector<2x8x32xf32>
    %c0_29 = arith.constant 0 : index
    %c0_30 = arith.constant 0 : index
    %c0_31 = arith.constant 0 : index
    %67 = vector.load %arg7[%c0_29, %c0_30, %c0_31] : memref<2x8x32xf32, #tpu.memory_space<vmem>>, vector<2x8x32xf32>
    tpu.vector_store %arg7[%c0_29, %c0_30, %c0_31], %66 {strides = array<i32>} : memref<2x8x32xf32, #tpu.memory_space<vmem>>, vector<2x8x32xf32>,
    return
  }
}

</mosaic_0001>

<bundles_post_ra>
// kernel: tpu_custom_call.1
= control target key start
LH: loop header
LB: loop body
LE: loop exit
PB: predicated region body
PF: predicated region fallthrough
CT: control target
= control target key end

     0   :  { %13 = vsyncpa [#allocation3], 0  ;;  %s1962_s0 = inlined_call_operand.hbm [shape: bf16[8,8,8], index: 0, kind: input, shape index: {}]   ;;  %s1963_s1 = inlined_call_operand.hbm [shape: bf16[8,8,8], index: 1, kind: input, shape index: {}]   ;;  %s1964_s2 = inlined_call_operand.hbm [shape: bf16[8,8,8], index: 2, kind: input, shape index: {}]   ;;  %s1965_s3 = inlined_call_operand.hbm [shape: f32[8,8,8], index: 3, kind: input, shape index: {}]   ;;  %s1966_s4 = inlined_call_operand.hbm [shape: bf16[4,8,32], index: 4, kind: input, shape index: {}]   ;;  %s1967_s5 = inlined_call_operand.vmem [shape: f32[1,32], index: 5, kind: input, shape index: {}]   ;;  %s1968_s6 = inlined_call_operand.hbm [shape: f32[8,8,8], index: 6, kind: output, shape index: {0}]   ;;  %s1969_s7 = inlined_call_operand.hbm [shape: f32[2,8,32], index: 7, kind: output, shape index: {1}]  }
   0x1   :  { %14 = vsyncpa [#allocation6], 0 }
   0x2   :  { %15 = vsyncpa [#allocation9], 0 }
   0x3   :  { %16 = vsyncpa [#allocation4], 0 }
   0x4   :  { %17 = vsyncpa [#allocation13], 0  ;;  %s1631_s24 = smov [#allocation5]   ;;  %s1632_s26 = smov [#allocation8]  }
   0x5   :  { %s35_s25 = sshll.u32 %s1631_s24, 4  ;;  %s59_s27 = sshll.u32 %s1632_s26, 4  ;;  %s36_s25 = int_to_ptr.vmem [resolvable:$true] %s35_s25  ;;  %s1684_s27 = int_to_ptr.vmem [resolvable:$true] %s59_s27 }
   0x6   :  { %s1467_s30 = scalar_lea.hbm %s1963_s1, 512 }
   0x7   :  { %p1468_p0 = scmp.ne.s32.totalorder %s1963_s1, %s1467_s30  ;;  %p1471_p1 = scmp.lt.u32.totalorder %s1467_s30, %s1963_s1 }
   0x9   :  { %p1473_p2 = pnand %p1471_p1, %p1468_p0 }
   0xb   :  { %1476 = shalt.err (!%p1473_p2)
}
   0xc   :  { %s1477_s12 = scalar_lea.vmem %s36_s25, 512  ;;  %p1482_p4 = scmp.lt.s32.totalorder %s36_s25, %s36_s25 }
   0xd   :  { %p1478_p3 = scmp.ne.s32.totalorder %s36_s25, %s1477_s12  ;;  %p1483_p5 = scmp.lt.s32.totalorder %s1477_s12, %s1477_s12 }
   0xf   :  { %p1484_p6 = por %p1483_p5, %p1482_p4 }
  0x11   :  { %p1485_p7 = pnand %p1484_p6, %p1478_p3 }
  0x13   :  { %1488 = shalt.err (!%p1485_p7)
}
  0x14   :  { %s1633_s13 = smov 64   ;;  %s1634_s14 = smov 4  }
  0x15   :  { %41 = dma.hbm_to_vmem [thread:$0]  %s1963_s1, 512, %s36_s25, [#allocation6], %s1633_s13, %s1633_s13, %s1634_s14  }
  0x16   :  { %s1489_s19 = scalar_lea.hbm %s1965_s3, 1024 }
  0x17   :  { %p1490_p8 = scmp.ne.s32.totalorder %s1965_s3, %s1489_s19  ;;  %p1493_p9 = scmp.lt.u32.totalorder %s1489_s19, %s1965_s3 }
  0x19   :  { %p1495_p10 = pnand %p1493_p9, %p1490_p8 }
  0x1b   :  { %1498 = shalt.err (!%p1495_p10)
}
  0x1c   :  { %s1499_s24 = scalar_lea.vmem %s1684_s27, 1024  ;;  %p1504_p12 = scmp.lt.s32.totalorder %s1684_s27, %s1684_s27 }
  0x1d   :  { %p1500_p11 = scmp.ne.s32.totalorder %s1684_s27, %s1499_s24  ;;  %p1505_p13 = scmp.lt.s32.totalorder %s1499_s24, %s1499_s24 }
  0x1f   :  { %p1506_p0 = por %p1505_p13, %p1504_p12 }
  0x21   :  { %p1507_p1 = pnand %p1506_p0, %p1500_p11 }
  0x23   :  { %1510 = shalt.err (!%p1507_p1)
}
  0x24   :  { %s1635_s1 = smov 128   ;;  %s1636_s25 = smov 8  }
  0x25   :  { %65 = dma.hbm_to_vmem [thread:$0]  %s1965_s3, 1024, %s1684_s27, [#allocation9], %s1635_s1, %s1635_s1, %s1636_s25  }
  0x26   :  { %s1637_s29 = smov [#allocation2]   ;;  %s1638_s8 = smov [#allocation7]  }
  0x27   :  { %s23_s30 = sshll.u32 %s1637_s29, 4  ;;  %s47_s9 = sshll.u32 %s1638_s8, 4  ;;  %s24_s30 = int_to_ptr.vmem [resolvable:$true] %s23_s30  ;;  %s1721_s9 = int_to_ptr.vmem [resolvable:$true] %s47_s9 }
  0x28   :  { %s1511_s12 = scalar_lea.hbm %s1962_s0, 512 }
  0x29   :  { %p1512_p2 = scmp.ne.s32.totalorder %s1962_s0, %s1511_s12  ;;  %p1515_p3 = scmp.lt.u32.totalorder %s1511_s12, %s1962_s0 }
  0x2b   :  { %p1517_p4 = pnand %p1515_p3, %p1512_p2 }
  0x2d   :  { %1520 = shalt.err (!%p1517_p4)
}
  0x2e   :  { %s1521_s3 = scalar_lea.vmem %s24_s30, 512  ;;  %p1526_p6 = scmp.lt.s32.totalorder %s24_s30, %s24_s30 }
  0x2f   :  { %p1522_p5 = scmp.ne.s32.totalorder %s24_s30, %s1521_s3  ;;  %p1527_p7 = scmp.lt.s32.totalorder %s1521_s3, %s1521_s3 }
  0x31   :  { %p1528_p8 = por %p1527_p7, %p1526_p6 }
  0x33   :  { %p1529_p9 = pnand %p1528_p8, %p1522_p5 }
  0x35   :  { %1532 = shalt.err (!%p1529_p9)
}
  0x36   :  { %29 = dma.hbm_to_vmem [thread:$0]  %s1962_s0, 512, %s24_s30, [#allocation3], %s1633_s13, %s1633_s13, %s1634_s14  }
  0x37   :  { %s1533_s22 = scalar_lea.hbm %s1964_s2, 512 }
  0x38   :  { %p1534_p10 = scmp.ne.s32.totalorder %s1964_s2, %s1533_s22  ;;  %p1537_p11 = scmp.lt.u32.totalorder %s1533_s22, %s1964_s2 }
  0x3a   :  { %p1539_p12 = pnand %p1537_p11, %p1534_p10 }
  0x3c   :  { %1542 = shalt.err (!%p1539_p12)
}
  0x3d   :  { %s1543_s29 = scalar_lea.vmem %s1721_s9, 512  ;;  %p1548_p0 = scmp.lt.s32.totalorder %s1721_s9, %s1721_s9 }
  0x3e   :  { %p1544_p13 = scmp.ne.s32.totalorder %s1721_s9, %s1543_s29  ;;  %p1549_p1 = scmp.lt.s32.totalorder %s1543_s29, %s1543_s29 }
  0x40   :  { %p1550_p2 = por %p1549_p1, %p1548_p0 }
  0x42   :  { %p1551_p3 = pnand %p1550_p2, %p1544_p13 }
  0x44   :  { %1554 = shalt.err (!%p1551_p3)
}
  0x45   :  { %53 = dma.hbm_to_vmem [thread:$0]  %s1964_s2, 512, %s1721_s9, [#allocation6], %s1633_s13, %s1633_s13, %s1634_s14  }
  0x46   :  { %s1639_s8 = smov [#allocation10]   ;;  %s1555_s15 = scalar_lea.hbm %s1966_s4, 256 }
  0x47   :  { %s71_s10 = sshll.u32 %s1639_s8, 4  ;;  %p1556_p4 = scmp.ne.s32.totalorder %s1966_s4, %s1555_s15  ;;  %s72_s10 = int_to_ptr.vmem [resolvable:$true] %s71_s10 }
  0x48   :  { %p1559_p5 = scmp.lt.u32.totalorder %s1555_s15, %s1966_s4 }
  0x4a   :  { %p1561_p6 = pnand %p1559_p5, %p1556_p4 }
  0x4c   :  { %1564 = shalt.err (!%p1561_p6)
}
  0x4d   :  { %s1565_s27 = scalar_lea.vmem %s72_s10, 256  ;;  %p1570_p8 = scmp.lt.s32.totalorder %s72_s10, %s72_s10 }
  0x4e   :  { %p1566_p7 = scmp.ne.s32.totalorder %s72_s10, %s1565_s27  ;;  %p1571_p9 = scmp.lt.s32.totalorder %s1565_s27, %s1565_s27 }
  0x50   :  { %p1572_p10 = por %p1571_p9, %p1570_p8 }
  0x52   :  { %p1573_p11 = pnand %p1572_p10, %p1566_p7 }
  0x54   :  { %1576 = shalt.err (!%p1573_p11)
}
  0x55   :  { %77 = dma.hbm_to_vmem [thread:$0]  %s1966_s4, 256, %s72_s10, [#allocation9], %s1633_s13, %s1633_s13, %s1634_s14  }
  0x56   :  { %1621 = dma.done.wait [#allocation3], 512  }
  0x57   :  { %1622 = vsyncadd [#allocation3], 4294966784 }
  0x58   :  { %1623 = dma.done.wait [#allocation6], 1024  }
  0x59   :  { %1624 = vsyncadd [#allocation6], 4294966272 }
  0x5a   :  { %1625 = dma.done.wait [#allocation9], 1280  }
  0x5b   :  { %1626 = vsyncadd [#allocation9], 4294966016  ;;  %v1640_v0 = vmov 0.0   ;;  %vm1641_vm0 = vmmov 0   ;;  %vm128_vm1 = vcmask 64512   ;;  %v120_v25 = vld [vmem:[#allocation8] sm:$0xff] }
  0x5c   :  { %1302 = vmatprep.subr.bf16.mxu0 %v1640_v0  ;;  %1308 = vmatprep.subr.bf16.mxu1 %v1640_v0  ;;  %v104_v1 = vld [vmem:[#allocation5] sm:$0xf]  ;;  %v105_v2 = vld [vmem:[#allocation5 + $0x4] sm:$0xf]  ;;  %v106_v5 = vld [vmem:[#allocation5 + $0x8] sm:$0xf] }
  0x5d   :  { %1304 = vmatprep.mubr.msk.bf16.mxu0 %vm1641_vm0, %v1640_v0  ;;  %1310 = vmatprep.mubr.msk.bf16.mxu1 %vm1641_vm0, %v1640_v0  ;;  %v133_v3 = vsel %vm128_vm1, %v104_v1, 0  ;;  %v179_v4 = vsel %vm128_vm1, %v105_v2, 0  ;;  %v107_v6 = vld [vmem:[#allocation5 + $0xc] sm:$0xf]  ;;  %v96_v7 = vld [vmem:[#allocation2] sm:$0xf] }
  0x5e   :  { %1303 = vmatpush3.bf16.xpose.msra.mxu0 %v133_v3  ;;  %1309 = vmatpush3.bf16.xpose.msra.mxu1 %v179_v4  ;;  %v97_v8 = vld [vmem:[#allocation2 + $0x4] sm:$0xf]  ;;  %v225_v9 = vsel %vm128_vm1, %v106_v5, 0  ;;  %v271_v10 = vsel %vm128_vm1, %v107_v6, 0  ;;  %v108_v11 = vld [vmem:[#allocation5 + $0x10] sm:$0xf] }
  0x5f   :  { %1314 = vmatprep.subr.bf16.mxu0 %v1640_v0  ;;  %1320 = vmatprep.subr.bf16.mxu1 %v1640_v0  ;;  %v109_v12 = vld [vmem:[#allocation5 + $0x14] sm:$0xf]  ;;  %v98_v13 = vld [vmem:[#allocation2 + $0x8] sm:$0xf]  ;;  %v99_v14 = vld [vmem:[#allocation2 + $0xc] sm:$0xf] }
  0x60   :  { %v317_v15 = vsel %vm128_vm1, %v108_v11, 0  ;;  %v363_v16 = vsel %vm128_vm1, %v109_v12, 0  ;;  %v110_v17 = vld [vmem:[#allocation5 + $0x18] sm:$0xf]  ;;  %v111_v18 = vld [vmem:[#allocation5 + $0x1c] sm:$0xf] }
  0x61   :  { %v100_v19 = vld [vmem:[#allocation2 + $0x10] sm:$0xf]  ;;  %v101_v20 = vld [vmem:[#allocation2 + $0x14] sm:$0xf]  ;;  %v409_v21 = vsel %vm128_vm1, %v110_v17, 0  ;;  %v455_v22 = vsel %vm128_vm1, %v111_v18, 0 }
  0x62   :  { %v102_v23 = vld [vmem:[#allocation2 + $0x18] sm:$0xf]  ;;  %v103_v24 = vld [vmem:[#allocation2 + $0x1c] sm:$0xf]  ;;  %v121_v26 = vld [vmem:[#allocation8 + $0x8] sm:$0xff]  ;;  %vm505_vm2 = vcmp.ne.f32.partialorder %v120_v25, 0.0 }
  0x63   :  { %vm506_vm3 = vcmp.ne.f32.partialorder %v121_v26, 0.0  ;;  %v122_v40 = vld [vmem:[#allocation8 + $0x10] sm:$0xff]  ;;  %v123_v41 = vld [vmem:[#allocation8 + $0x18] sm:$0xff]  ;;  %v125_v56 = vld [vmem:[#allocation8 + $0x28] sm:$0xff]  ;;  %vm628_vm10 = vcmask 1043456   ;;  %s1642_s4 = smov [#allocation11]  }
  0x64   :  { %vm507_vm4 = vcmp.ne.f32.partialorder %v122_v40, 0.0  ;;  %vm508_vm5 = vcmp.ne.f32.partialorder %v123_v41, 0.0  ;;  %v124_v57 = vld [vmem:[#allocation8 + $0x20] sm:$0xff]  ;;  %vm510_vm6 = vcmp.ne.f32.partialorder %v125_v56, 0.0  ;;  %v126_v11 = vld [vmem:[#allocation8 + $0x30] sm:$0xff]  ;;  %s1211_s13 = sshll.u32 %s1642_s4, 4  ;;  %s1212_s13 = int_to_ptr.vmem [resolvable:$true] %s1211_s13 }
  0x65   :  { %1305 = vmatmul.mubr.msk.bf16.vlgmr.msra.gmra.mrb[0].mxu0 %vm128_vm1, %v96_v7  ;;  %1311 = vmatmul.mubr.msk.bf16.vlgmr.msra.gmra.mrb[0].mxu1 %vm128_vm1, %v97_v8  ;;  %vm509_vm7 = vcmp.ne.f32.partialorder %v124_v57, 0.0  ;;  %vm511_vm9 = vcmp.ne.f32.partialorder %v126_v11, 0.0  ;;  %v114_v11 = vld [vmem:[#allocation7 + $0x8] sm:$0xf]  ;;  %s1577_s14 = scalar_lea.vmem %s1212_s13, 1024  ;;  %p1582_p13 = scmp.lt.s32.totalorder %s1212_s13, %s1212_s13 }
  0x66   :  { %1315 = vmatpush3.bf16.xpose.msra.mxu0 %v225_v9  ;;  %1321 = vmatpush3.bf16.xpose.msra.mxu1 %v271_v10  ;;  %v127_v10 = vld [vmem:[#allocation8 + $0x38] sm:$0xff]  ;;  %p1578_p12 = scmp.ne.s32.totalorder %s1212_s13, %s1577_s14  ;;  %p1583_p0 = scmp.lt.s32.totalorder %s1577_s14, %s1577_s14 }
  0x67   :  { %1316 = vmatprep.mubr.msk.bf16.mxu0 %vm1641_vm0, %v1640_v0  ;;  %1322 = vmatprep.mubr.msk.bf16.mxu1 %vm1641_vm0, %v1640_v0  ;;  %vm512_vm8 = vcmp.ne.f32.partialorder %v127_v10, 0.0 }
  0x68   :  { %1326 = vmatprep.subr.bf16.mxu0 %v1640_v0  ;;  %1332 = vmatprep.subr.bf16.mxu1 %v1640_v0  ;;  %p1584_p1 = por %p1583_p0, %p1582_p13 }
  0x6a   :  { %p1585_p2 = pnand %p1584_p1, %p1578_p12 }
  0x6d   :  { %1317 = vmatmul.mubr.msk.bf16.vlgmr.msra.gmra.mrb[4].mxu0 %vm128_vm1, %v98_v13  ;;  %1323 = vmatmul.mubr.msk.bf16.vlgmr.msra.gmra.mrb[4].mxu1 %vm128_vm1, %v99_v14 }
  0x6e   :  { %1327 = vmatpush3.bf16.xpose.msra.mxu0 %v317_v15  ;;  %1333 = vmatpush3.bf16.xpose.msra.mxu1 %v363_v16 }
  0x6f   :  { %1328 = vmatprep.mubr.msk.bf16.mxu0 %vm1641_vm0, %v1640_v0  ;;  %1334 = vmatprep.mubr.msk.bf16.mxu1 %vm1641_vm0, %v1640_v0 }
  0x70   :  { %1338 = vmatprep.subr.bf16.mxu0 %v1640_v0  ;;  %1344 = vmatprep.subr.bf16.mxu1 %v1640_v0 }
  0x75   :  { %1329 = vmatmul.mubr.msk.bf16.vlgmr.msra.gmra.mrb[8].mxu0 %vm128_vm1, %v100_v19  ;;  %1335 = vmatmul.mubr.msk.bf16.vlgmr.msra.gmra.mrb[8].mxu1 %vm128_vm1, %v101_v20 }
  0x76   :  { %1339 = vmatpush3.bf16.xpose.msra.mxu0 %v409_v21  ;;  %1345 = vmatpush3.bf16.xpose.msra.mxu1 %v455_v22 }
  0x77   :  { %1340 = vmatprep.mubr.msk.bf16.mxu0 %vm1641_vm0, %v1640_v0  ;;  %1346 = vmatprep.mubr.msk.bf16.mxu1 %vm1641_vm0, %v1640_v0 }
  0x78   :  { %1350 = vmatprep.subr.bf16.mxu0 %v1640_v0  ;;  %1356 = vmatprep.subr.bf16.mxu1 %v1640_v0 }
  0x7d   :  { %1341 = vmatmul.mubr.msk.bf16.vlgmr.msra.gmra.mrb[12].mxu0 %vm128_vm1, %v102_v23  ;;  %1347 = vmatmul.mubr.msk.bf16.vlgmr.msra.gmra.mrb[12].mxu1 %vm128_vm1, %v103_v24 }
  0x7e   :  { %1352 = vmatprep.mubr.msk.bf16.mxu0 %vm1641_vm0, %v1640_v0  ;;  %1358 = vmatprep.mubr.msk.bf16.mxu1 %vm1641_vm0, %v1640_v0 }
 0x138   :  { %v169_v27 = vpop.f32.mrb[0].mxu0  ;;  %v215_v28 = vpop.f32.mrb[0].mxu1 }
 0x139   :  { %v497_v29 = vmul.f32 0.35355338, %v169_v27  ;;  %v1306_v30 = vpop.f32.mrb[1].mxu0  ;;  %v498_v31 = vmul.f32 0.35355338, %v215_v28  ;;  %v1312_v32 = vpop.f32.mrb[1].mxu1 }
 0x13a   :  { %v172_v33 = vpop.f32.mrb[2].mxu0  ;;  %v218_v34 = vpop.f32.mrb[2].mxu1 }
 0x13b   :  { %v1307_v35 = vpop.f32.mrb[3].mxu0  ;;  %v1313_v36 = vpop.f32.mrb[3].mxu1  ;;  %v1819_v37 = vsel %vm505_vm2, -1e+09, %v497_v29  ;;  %v1821_v38 = vsel %vm506_vm3, -1e+09, %v498_v31 }
 0x13c   :  { %v521_v39 = vsel %vm128_vm1, %v1819_v37, -inf  ;;  %v524_v42 = vsel %vm128_vm1, %v1821_v38, -inf }
 0x13d   :  { %522 = vmax.xlane.f32.xlu0 %v521_v39 }
 0x140   :  { %v261_v43 = vpop.f32.mrb[4].mxu0  ;;  %v307_v44 = vpop.f32.mrb[4].mxu1 }
 0x141   :  { %v499_v45 = vmul.f32 0.35355338, %v261_v43  ;;  %525 = vmax.xlane.f32.xlu0 %v524_v42  ;;  %v1318_v46 = vpop.f32.mrb[5].mxu0  ;;  %v500_v47 = vmul.f32 0.35355338, %v307_v44  ;;  %v1324_v48 = vpop.f32.mrb[5].mxu1 }
 0x142   :  { %v264_v49 = vpop.f32.mrb[6].mxu0  ;;  %v310_v50 = vpop.f32.mrb[6].mxu1 }
 0x143   :  { %v1319_v51 = vpop.f32.mrb[7].mxu0  ;;  %v1325_v52 = vpop.f32.mrb[7].mxu1  ;;  %v515_v53 = vsel %vm507_vm4, -1e+09, %v499_v45  ;;  %v516_v54 = vsel %vm508_vm5, -1e+09, %v500_v47 }
 0x144   :  { %v527_v55 = vsel %vm128_vm1, %v515_v53, -inf  ;;  %v530_v58 = vsel %vm128_vm1, %v516_v54, -inf }
 0x145   :  { %528 = vmax.xlane.f32.xlu1 %v527_v55 }
 0x148   :  { %v353_v59 = vpop.f32.mrb[8].mxu0  ;;  %v399_v60 = vpop.f32.mrb[8].mxu1 }
 0x149   :  { %v501_v61 = vmul.f32 0.35355338, %v353_v59  ;;  %v502_v62 = vmul.f32 0.35355338, %v399_v60  ;;  %531 = vmax.xlane.f32.xlu1 %v530_v58  ;;  %v1330_v63 = vpop.f32.mrb[9].mxu0  ;;  %v1336_v1 = vpop.f32.mrb[9].mxu1 }
 0x14a   :  { %v356_v2 = vpop.f32.mrb[10].mxu0  ;;  %v402_v3 = vpop.f32.mrb[10].mxu1 }
 0x14b   :  { %v1337_v4 = vpop.f32.mrb[11].mxu1  ;;  %v518_v5 = vsel %vm510_vm6, -1e+09, %v502_v62  ;;  %v517_v6 = vsel %vm509_vm7, -1e+09, %v501_v61  ;;  %v1331_v7 = vpop.f32.mrb[11].mxu0 }
 0x14c   :  { %v536_v8 = vsel %vm128_vm1, %v518_v5, -inf  ;;  %v533_v9 = vsel %vm128_vm1, %v517_v6, -inf  ;;  %v112_v3 = vld [vmem:[#allocation7] sm:$0xf] }
 0x14d   :  { %537 = vmax.xlane.f32.xlu1 %v536_v8  ;;  %534 = vmax.xlane.f32.xlu0 %v533_v9  ;;  %v630_v4 = vsel %vm628_vm10, %v112_v3, 0 }
 0x14e   :  { %1351 = vmatpush3.bf16.msra.mxu0 %v630_v4 }
 0x14f   :  { %1362 = vmatprep.subr.bf16.mxu0 %v1640_v0 }
 0x150   :  { %v445_v12 = vpop.f32.mrb[12].mxu0  ;;  %v491_v13 = vpop.f32.mrb[12].mxu1 }
 0x151   :  { %v503_v14 = vmul.f32 0.35355338, %v445_v12  ;;  %v504_v15 = vmul.f32 0.35355338, %v491_v13  ;;  %v1342_v16 = vpop.f32.mrb[13].mxu0  ;;  %v1348_v17 = vpop.f32.mrb[13].mxu1 }
 0x152   :  { %v448_v18 = vpop.f32.mrb[14].mxu0  ;;  %v494_v19 = vpop.f32.mrb[14].mxu1  ;;  %v115_v17 = vld [vmem:[#allocation7 + $0xc] sm:$0xf] }
 0x153   :  { %v520_v20 = vsel %vm512_vm8, -1e+09, %v504_v15  ;;  %v519_v21 = vsel %vm511_vm9, -1e+09, %v503_v14  ;;  %v1343_v22 = vpop.f32.mrb[15].mxu0  ;;  %v1349_v23 = vpop.f32.mrb[15].mxu1 }
 0x154   :  { %v542_v24 = vsel %vm128_vm1, %v520_v20, -inf  ;;  %v539_v25 = vsel %vm128_vm1, %v519_v21, -inf  ;;  %v722_v15 = vsel %vm628_vm10, %v114_v11, 0  ;;  %v768_v22 = vsel %vm628_vm10, %v115_v17, 0 }
 0x155   :  { %543 = vmax.xlane.f32.xlu1 %v542_v24  ;;  %540 = vmax.xlane.f32.xlu0 %v539_v25  ;;  %v116_v24 = vld [vmem:[#allocation7 + $0x10] sm:$0xf] }
 0x1ca   :  { %v523_v26 = vpop.xlane.xlu0 %522 }
 0x1cb   :  { %v545_v27 = vsub.f32 %v1819_v37, %v523_v26 }
 0x1cd   :  { %v553_v28 = vmul.f32 1.442695, %v545_v27  ;;  %v814_v27 = vsel %vm628_vm10, %v116_v24, 0 }
 0x1ce   :  { %v526_v29 = vpop.xlane.xlu0 %525 }
 0x1cf   :  { %1435 = vpow2.f32 %v553_v28  ;;  %v546_v30 = vsub.f32 %v1821_v38, %v526_v29  ;;  %v117_v29 = vld [vmem:[#allocation7 + $0x14] sm:$0xf] }
 0x1d1   :  { %v555_v31 = vmul.f32 1.442695, %v546_v30 }
 0x1d2   :  { %v529_v32 = vpop.xlane.xlu1 %528 }
 0x1d3   :  { %1437 = vpow2.f32 %v555_v31  ;;  %v547_v33 = vsub.f32 %v515_v53, %v529_v32 }
 0x1d5   :  { %v557_v34 = vmul.f32 1.442695, %v547_v33 }
 0x1d6   :  { %v532_v35 = vpop.xlane.xlu1 %531 }
 0x1d7   :  { %1439 = vpow2.f32 %v557_v34  ;;  %v548_v36 = vsub.f32 %v516_v54, %v532_v35  ;;  %v860_v34 = vsel %vm628_vm10, %v117_v29, 0 }
 0x1d9   :  { %v1436_v39 = vpop.eup %1435  ;;  %v559_v40 = vmul.f32 1.442695, %v548_v36 }
 0x1da   :  { %v538_v41 = vpop.xlane.xlu1 %537  ;;  %v535_v42 = vpop.xlane.xlu0 %534  ;;  %v569_v43 = vsel %vm128_vm1, %v1436_v39, 0.0 }
 0x1db   :  { %1441 = vpow2.f32 %v559_v40  ;;  %v550_v37 = vsub.f32 %v518_v5, %v538_v41  ;;  %v549_v44 = vsub.f32 %v517_v6, %v535_v42  ;;  %570 = vadd.xlane.f32.xlu0 %v569_v43  ;;  %v113_v5 = vld [vmem:[#allocation7 + $0x4] sm:$0xf]  ;;  %v118_v40 = vld [vmem:[#allocation7 + $0x18] sm:$0xf] }
 0x1dc   :  { %v676_v6 = vsel %vm628_vm10, %v113_v5, 0  ;;  %v906_v43 = vsel %vm628_vm10, %v118_v40, 0 }
 0x1dd   :  { %v1438_v45 = vpop.eup %1437  ;;  %v563_v38 = vmul.f32 1.442695, %v550_v37  ;;  %v561_v46 = vmul.f32 1.442695, %v549_v44  ;;  %1357 = vmatpush3.bf16.msra.mxu1 %v676_v6  ;;  %v119_v37 = vld [vmem:[#allocation7 + $0x1c] sm:$0xf] }
 0x1de   :  { %v572_v47 = vsel %vm128_vm1, %v1438_v45, 0.0  ;;  %1368 = vmatprep.subr.bf16.mxu1 %v1640_v0 }
 0x1df   :  { %1443 = vpow2.f32 %v563_v38  ;;  %573 = vadd.xlane.f32.xlu1 %v572_v47 }
 0x1e0   :  { %1445 = vpow2.f32 %v561_v46 }
 0x1e1   :  { %v1837_v48 = vpop.eup %1439 }
 0x1e2   :  { %v544_v49 = vpop.xlane.xlu1 %543  ;;  %v541_v50 = vpop.xlane.xlu0 %540  ;;  %v575_v51 = vsel %vm128_vm1, %v1837_v48, 0.0 }
 0x1e3   :  { %v552_v52 = vsub.f32 %v520_v20, %v544_v49  ;;  %v551_v53 = vsub.f32 %v519_v21, %v541_v50  ;;  %576 = vadd.xlane.f32.xlu0 %v575_v51  ;;  %v994_v51 = vld [vmem:[#allocation10] sm:$0xf] }
 0x1e5   :  { %v1841_v54 = vpop.eup %1441  ;;  %v567_v55 = vmul.f32 1.442695, %v552_v52  ;;  %v565_v56 = vmul.f32 1.442695, %v551_v53  ;;  %v1051_v52 = vsel %vm628_vm10, %v994_v51, 0 }
 0x1e6   :  { %v578_v57 = vsel %vm128_vm1, %v1841_v54, 0.0  ;;  %v995_v53 = vld [vmem:[#allocation10 + $0x4] sm:$0xf] }
 0x1e7   :  { %1447 = vpow2.f32 %v567_v55  ;;  %579 = vadd.xlane.f32.xlu1 %v578_v57 }
 0x1e8   :  { %1449 = vpow2.f32 %v565_v56 }
 0x1e9   :  { %v1845_v58 = vpop.eup %1443 }
 0x1ea   :  { %v1847_v59 = vpop.eup %1445  ;;  %v584_v60 = vsel %vm128_vm1, %v1845_v58, 0.0 }
 0x1eb   :  { %585 = vadd.xlane.f32.xlu1 %v584_v60  ;;  %v581_v61 = vsel %vm128_vm1, %v1847_v59, 0.0 }
 0x1ec   :  { %582 = vadd.xlane.f32.xlu0 %v581_v61 }
 0x1f1   :  { %v1853_v62 = vpop.eup %1447 }
 0x1f2   :  { %v1855_v63 = vpop.eup %1449  ;;  %v590_v1 = vsel %vm128_vm1, %v1853_v62, 0.0 }
 0x1f3   :  { %591 = vadd.xlane.f32.xlu1 %v590_v1  ;;  %v587_v2 = vsel %vm128_vm1, %v1855_v63, 0.0 }
 0x1f4   :  { %588 = vadd.xlane.f32.xlu0 %v587_v2 }
 0x268   :  { %v571_v7 = vpop.xlane.xlu0 %570 }
 0x269   :  { %1451 = vrcp.f32 %v571_v7 }
 0x26c   :  { %v574_v8 = vpop.xlane.xlu1 %573 }
 0x26d   :  { %1453 = vrcp.f32 %v574_v8  ;;  %v997_v8 = vld [vmem:[#allocation10 + $0xc] sm:$0xf] }
 0x270   :  { %v577_v9 = vpop.xlane.xlu0 %576 }
 0x271   :  { %1455 = vrcp.f32 %v577_v9 }
 0x273   :  { %v1452_v10 = vpop.eup %1451 }
 0x274   :  { %v594_v12 = vmul.f32 %v1452_v10, %v1436_v39  ;;  %v580_v13 = vpop.xlane.xlu1 %579 }
 0x275   :  { %1457 = vrcp.f32 %v580_v13  ;;  %v1149_v13 = vsel %vm628_vm10, %v997_v8, 0 }
 0x276   :  { %609 = vst.msk [vmem:[#allocation11] sm:$0xff] %vm128_vm1, %v594_v12  ;;  %v617_v14 = vpack.c.bf16 %v594_v12, %v594_v12  ;;  %v996_v12 = vld [vmem:[#allocation10 + $0x8] sm:$0xf] }
 0x277   :  { %v1454_v16 = vpop.eup %1453 }
 0x278   :  { %v596_v18 = vmul.f32 %v1454_v16, %v1438_v45  ;;  %v586_v19 = vpop.xlane.xlu1 %585  ;;  %1353 = vmatmul.mubr.msk.bf16.vlgmr.msra.gmra.mrb[16].mxu0 %vm128_vm1, %v617_v14  ;;  %v952_v45 = vsel %vm628_vm10, %v119_v37, 0 }
 0x279   :  { %1459 = vrcp.f32 %v586_v19  ;;  %v583_v20 = vpop.xlane.xlu0 %582  ;;  %1363 = vmatpush3.bf16.msra.mxu0 %v722_v15  ;;  %1364 = vmatprep.mubr.msk.bf16.mxu0 %vm1641_vm0, %v1640_v0  ;;  %v1099_v19 = vsel %vm628_vm10, %v996_v12, 0 }
 0x27a   :  { %610 = vst.msk [vmem:[#allocation11 + $0x8] sm:$0xff] %vm128_vm1, %v596_v18  ;;  %1461 = vrcp.f32 %v583_v20  ;;  %v618_v21 = vpack.c.bf16 %v596_v18, %v596_v18  ;;  %1374 = vmatprep.subr.bf16.mxu0 %v1640_v0 }
 0x27b   :  { %v1456_v23 = vpop.eup %1455 }
 0x27c   :  { %v598_v25 = vmul.f32 %v1456_v23, %v1837_v48  ;;  %1359 = vmatmul.mubr.msk.bf16.vlgmr.msra.gmra.mrb[16].mxu1 %vm128_vm1, %v618_v21 }
 0x27d   :  { %1369 = vmatpush3.bf16.msra.mxu1 %v768_v22  ;;  %1370 = vmatprep.mubr.msk.bf16.mxu1 %vm1641_vm0, %v1640_v0 }
 0x27e   :  { %611 = vst.msk [vmem:[#allocation11 + $0x10] sm:$0xff] %vm128_vm1, %v598_v25  ;;  %v619_v26 = vpack.c.bf16 %v598_v25, %v598_v25  ;;  %1380 = vmatprep.subr.bf16.mxu1 %v1640_v0 }
 0x27f   :  { %v1458_v28 = vpop.eup %1457 }
 0x280   :  { %v600_v30 = vmul.f32 %v1458_v28, %v1841_v54  ;;  %v592_v31 = vpop.xlane.xlu1 %591  ;;  %1365 = vmatmul.mubr.msk.bf16.vlgmr.msra.gmra.mrb[20].mxu0 %vm128_vm1, %v619_v26  ;;  %v1004_v54 = vsel %vm628_vm10, %v995_v53, 0 }
 0x281   :  { %1463 = vrcp.f32 %v592_v31  ;;  %v589_v32 = vpop.xlane.xlu0 %588  ;;  %1375 = vmatpush3.bf16.msra.mxu0 %v814_v27  ;;  %1376 = vmatprep.mubr.msk.bf16.mxu0 %vm1641_vm0, %v1640_v0 }
 0x282   :  { %612 = vst.msk [vmem:[#allocation11 + $0x18] sm:$0xff] %vm128_vm1, %v600_v30  ;;  %1465 = vrcp.f32 %v589_v32  ;;  %v620_v33 = vpack.c.bf16 %v600_v30, %v600_v30  ;;  %1386 = vmatprep.subr.bf16.mxu0 %v1640_v0 }
 0x283   :  { %v1460_v35 = vpop.eup %1459 }
 0x284   :  { %v1462_v36 = vpop.eup %1461  ;;  %v604_v39 = vmul.f32 %v1460_v35, %v1845_v58  ;;  %1371 = vmatmul.mubr.msk.bf16.vlgmr.msra.gmra.mrb[20].mxu1 %vm128_vm1, %v620_v33 }
 0x285   :  { %v602_v41 = vmul.f32 %v1462_v36, %v1847_v59  ;;  %1381 = vmatpush3.bf16.msra.mxu1 %v860_v34  ;;  %1382 = vmatprep.mubr.msk.bf16.mxu1 %vm1641_vm0, %v1640_v0 }
 0x286   :  { %614 = vst.msk [vmem:[#allocation11 + $0x28] sm:$0xff] %vm128_vm1, %v604_v39  ;;  %1392 = vmatprep.subr.bf16.mxu1 %v1640_v0  ;;  %v622_v44 = vpack.c.bf16 %v604_v39, %v604_v39 }
 0x287   :  { %613 = vst.msk [vmem:[#allocation11 + $0x20] sm:$0xff] %vm128_vm1, %v602_v41  ;;  %v621_v42 = vpack.c.bf16 %v602_v41, %v602_v41 }
 0x289   :  { %1377 = vmatmul.mubr.msk.bf16.vlgmr.msra.gmra.mrb[24].mxu0 %vm128_vm1, %v621_v42 }
 0x28a   :  { %1387 = vmatpush3.bf16.msra.mxu0 %v906_v43  ;;  %1388 = vmatprep.mubr.msk.bf16.mxu0 %vm1641_vm0, %v1640_v0 }
 0x28b   :  { %v1464_v38 = vpop.eup %1463  ;;  %1398 = vmatprep.subr.bf16.mxu0 %v1640_v0 }
 0x28c   :  { %v1466_v46 = vpop.eup %1465  ;;  %v608_v47 = vmul.f32 %v1464_v38, %v1853_v62  ;;  %1383 = vmatmul.mubr.msk.bf16.vlgmr.msra.gmra.mrb[24].mxu1 %vm128_vm1, %v622_v44 }
 0x28d   :  { %v606_v48 = vmul.f32 %v1466_v46, %v1855_v63  ;;  %1393 = vmatpush3.bf16.msra.mxu1 %v952_v45  ;;  %1394 = vmatprep.mubr.msk.bf16.mxu1 %vm1641_vm0, %v1640_v0 }
 0x28e   :  { %616 = vst.msk [vmem:[#allocation11 + $0x38] sm:$0xff] %vm128_vm1, %v608_v47  ;;  %1404 = vmatprep.subr.bf16.mxu1 %v1640_v0  ;;  %v624_v50 = vpack.c.bf16 %v608_v47, %v608_v47 }
 0x28f   :  { %615 = vst.msk [vmem:[#allocation11 + $0x30] sm:$0xff] %vm128_vm1, %v606_v48  ;;  %v623_v49 = vpack.c.bf16 %v606_v48, %v606_v48 }
 0x291   :  { %1389 = vmatmul.mubr.msk.bf16.vlgmr.msra.gmra.mrb[28].mxu0 %vm128_vm1, %v623_v49 }
 0x292   :  { %1400 = vmatprep.mubr.msk.bf16.mxu0 %vm1641_vm0, %v1640_v0  ;;  %1399 = vmatpush3.bf16.msra.mxu0 %v1004_v54 }
 0x293   :  { %1410 = vmatprep.subr.bf16.mxu0 %v1640_v0 }
 0x294   :  { %1395 = vmatmul.mubr.msk.bf16.vlgmr.msra.gmra.mrb[28].mxu1 %vm128_vm1, %v624_v50 }
 0x295   :  { %1406 = vmatprep.mubr.msk.bf16.mxu1 %vm1641_vm0, %v1640_v0  ;;  %1405 = vmatpush3.bf16.msra.mxu1 %v1051_v52 }
 0x296   :  { %1416 = vmatprep.subr.bf16.mxu1 %v1640_v0 }
 0x34b   :  { %v666_v55 = vpop.f32.mrb[16].mxu0 }
 0x34c   :  { %v1354_v56 = vpop.f32.mrb[17].mxu0 }
 0x34d   :  { %v669_v57 = vpop.f32.mrb[18].mxu0 }
 0x34e   :  { %v1355_v58 = vpop.f32.mrb[19].mxu0 }
 0x34f   :  { %v712_v59 = vpop.f32.mrb[16].mxu1 }
 0x350   :  { %v1360_v60 = vpop.f32.mrb[17].mxu1 }
 0x351   :  { %v715_v61 = vpop.f32.mrb[18].mxu1 }
 0x352   :  { %v1361_v62 = vpop.f32.mrb[19].mxu1 }
 0x353   :  { %v758_v63 = vpop.f32.mrb[20].mxu0 }
 0x354   :  { %v1366_v1 = vpop.f32.mrb[21].mxu0 }
 0x355   :  { %v761_v2 = vpop.f32.mrb[22].mxu0 }
 0x356   :  { %v1367_v3 = vpop.f32.mrb[23].mxu0 }
 0x357   :  { %v804_v4 = vpop.f32.mrb[20].mxu1 }
 0x358   :  { %v1372_v5 = vpop.f32.mrb[21].mxu1 }
 0x359   :  { %v807_v6 = vpop.f32.mrb[22].mxu1 }
 0x35a   :  { %v1373_v7 = vpop.f32.mrb[23].mxu1 }
 0x35c   :  { %v850_v9 = vpop.f32.mrb[24].mxu0 }
 0x35d   :  { %v998_v10 = vpack.c.bf16 %v850_v9, %v666_v55  ;;  %v1378_v11 = vpop.f32.mrb[25].mxu0 }
 0x35e   :  { %v853_v14 = vpop.f32.mrb[26].mxu0 }
 0x35f   :  { %v1379_v15 = vpop.f32.mrb[27].mxu0  ;;  %1407 = vmatmul.mubr.msk.bf16.vlgmr.msra.gmra.mrb[32].mxu1 %vm128_vm1, %v998_v10  ;;  %v896_v16 = vpop.f32.mrb[24].mxu1 }
 0x360   :  { %v999_v17 = vpack.c.bf16 %v896_v16, %v712_v59  ;;  %v1384_v18 = vpop.f32.mrb[25].mxu1  ;;  %1417 = vmatpush3.bf16.msra.mxu1 %v1149_v13  ;;  %1418 = vmatprep.mubr.msk.bf16.mxu1 %vm1641_vm0, %v1640_v0 }
 0x361   :  { %v899_v20 = vpop.f32.mrb[26].mxu1 }
 0x362   :  { %v1385_v21 = vpop.f32.mrb[27].mxu1  ;;  %1401 = vmatmul.mubr.msk.bf16.vlgmr.msra.gmra.mrb[32].mxu0 %vm128_vm1, %v999_v17 }
 0x363   :  { %1411 = vmatpush3.bf16.msra.mxu0 %v1099_v19  ;;  %1412 = vmatprep.mubr.msk.bf16.mxu0 %vm1641_vm0, %v1640_v0 }
 0x364   :  { %v942_v22 = vpop.f32.mrb[28].mxu0 }
 0x365   :  { %v1094_v23 = vpack.c.bf16 %v942_v22, %v758_v63  ;;  %v1390_v24 = vpop.f32.mrb[29].mxu0 }
 0x366   :  { %v945_v25 = vpop.f32.mrb[30].mxu0 }
 0x367   :  { %v1391_v26 = vpop.f32.mrb[31].mxu0  ;;  %v988_v27 = vpop.f32.mrb[28].mxu1 }
 0x368   :  { %v1144_v28 = vpack.c.bf16 %v988_v27, %v804_v4  ;;  %v1396_v29 = vpop.f32.mrb[29].mxu1 }
 0x369   :  { %v991_v30 = vpop.f32.mrb[30].mxu1 }
 0x36a   :  { %v1397_v31 = vpop.f32.mrb[31].mxu1  ;;  %1413 = vmatmul.mubr.msk.bf16.vlgmr.msra.gmra.mrb[36].mxu0 %vm128_vm1, %v1094_v23  ;;  %1419 = vmatmul.mubr.msk.bf16.vlgmr.msra.gmra.mrb[36].mxu1 %vm128_vm1, %v1144_v28 }
 0x36b   :  { %1588 = shalt.err (!%p1585_p2)
}
 0x36c   :  { %s1589_s21 = scalar_lea.hbm %s1968_s6, 1024 }
 0x36d   :  { %p1590_p3 = scmp.ne.s32.totalorder %s1968_s6, %s1589_s21  ;;  %p1593_p4 = scmp.lt.u32.totalorder %s1589_s21, %s1968_s6 }
 0x36f   :  { %p1595_p5 = pnand %p1593_p4, %p1590_p3 }
 0x371   :  { %1598 = shalt.err (!%p1595_p5)
}
 0x372   :  { %1217 = dma.vmem_to_hbm [thread:$0]  %s1212_s13, 1024, %s1968_s6, [#allocation4], %s1635_s1, %s1635_s1, %s1636_s25   ;;  %vm1203_vm11 = vcmask 261120  }
 0x373   :  { %v1261_v46 = vld [vmem:[%s1967_s5] ss:$0 sm:$0xff]  ;;  %s1643_s6 = smov [#allocation12]  }
 0x374   :  { %s1223_s8 = sshll.u32 %s1643_s6, 4  ;;  %s1224_s8 = int_to_ptr.vmem [resolvable:$true] %s1223_s8 }
 0x375   :  { %s1599_s10 = scalar_lea.vmem %s1224_s8, 256  ;;  %p1604_p7 = scmp.lt.s32.totalorder %s1224_s8, %s1224_s8 }
 0x376   :  { %p1600_p6 = scmp.ne.s32.totalorder %s1224_s8, %s1599_s10  ;;  %p1605_p8 = scmp.lt.s32.totalorder %s1599_s10, %s1599_s10 }
 0x378   :  { %p1606_p9 = por %p1605_p8, %p1604_p7 }
 0x37a   :  { %p1607_p10 = pnand %p1606_p9, %p1600_p6 }
 0x432   :  { %v1087_v0 = vpop.f32.mrb[32].mxu1 }
 0x433   :  { %v1408_v32 = vpop.f32.mrb[33].mxu1 }
 0x434   :  { %v1090_v33 = vpop.f32.mrb[34].mxu1 }
 0x435   :  { %v1409_v34 = vpop.f32.mrb[35].mxu1  ;;  %v1040_v35 = vpop.f32.mrb[32].mxu0 }
 0x436   :  { %v1088_v36 = vadd.f32 %v1087_v0, %v1040_v35  ;;  %v1402_v39 = vpop.f32.mrb[33].mxu0 }
 0x437   :  { %v1043_v40 = vpop.f32.mrb[34].mxu0 }
 0x438   :  { %v1091_v41 = vadd.f32 %v1090_v33, %v1043_v40  ;;  %v1403_v42 = vpop.f32.mrb[35].mxu0 }
 0x43d   :  { %v1135_v43 = vpop.f32.mrb[36].mxu0  ;;  %v1185_v37 = vpop.f32.mrb[36].mxu1 }
 0x43e   :  { %v1142_v44 = vadd.f32 %v1135_v43, %v1088_v36  ;;  %v1414_v45 = vpop.f32.mrb[37].mxu0  ;;  %v1420_v38 = vpop.f32.mrb[37].mxu1 }
 0x43f   :  { %v1138_v47 = vpop.f32.mrb[38].mxu0  ;;  %v1188_v48 = vpop.f32.mrb[38].mxu1 }
 0x440   :  { %v1192_v49 = vadd.f32 %v1185_v37, %v1142_v44  ;;  %v1143_v50 = vadd.f32 %v1138_v47, %v1091_v41  ;;  %v1415_v51 = vpop.f32.mrb[39].mxu0  ;;  %v1421_v52 = vpop.f32.mrb[39].mxu1 }
 0x442   :  { %v1201_v53 = vadd.f32 %v1261_v46, %v1192_v49  ;;  %v1193_v54 = vadd.f32 %v1188_v48, %v1143_v50 }
 0x444   :  { %v1202_v55 = vadd.f32 %v1261_v46, %v1193_v54  ;;  %1204 = vst.msk [vmem:[#allocation12] sm:$0xff] %vm1203_vm11, %v1201_v53 }
 0x446   :  { %1205 = vst.msk [vmem:[#allocation12 + $0x8] sm:$0xff] %vm1203_vm11, %v1202_v55 }
 0x447   :  { %1610 = shalt.err (!%p1607_p10)
}
 0x448   :  { %s1611_s12 = scalar_lea.hbm %s1969_s7, 256 }
 0x449   :  { %p1612_p11 = scmp.ne.s32.totalorder %s1969_s7, %s1611_s12  ;;  %p1615_p12 = scmp.lt.u32.totalorder %s1611_s12, %s1969_s7 }
 0x44b   :  { %p1617_p13 = pnand %p1615_p12, %p1612_p11 }
 0x44d   :  { %1620 = shalt.err (!%p1617_p13)
}
 0x44e   :  { %1229 = dma.vmem_to_hbm [thread:$0]  %s1224_s8, 256, %s1969_s7, [#allocation13], %s1635_s1, %s1635_s1, %s1636_s25  }
 0x44f   :  { %1627 = dma.done.wait [#allocation4], 1024  }
 0x450   :  { %1628 = vsyncadd [#allocation4], 4294966272 }
 0x451   :  { %1629 = dma.done.wait [#allocation13], 256  }
 0x452   :  { %1630 = vsyncadd [#allocation13], 4294967040 }
 0x453   :  { %1236 = vsyncpa [#allocation3], 1 }
 0x454   :  { %1237 = vsyncpa [#allocation6], 1 }
 0x455   :  { %1238 = vsyncpa [#allocation9], 1 }
 0x456   :  { %1239 = vsyncpa [#allocation4], 1 }
 0x457   :  { %1240 = vsyncpa [#allocation13], 1 }

</bundles_post_ra>
